<compile_context>
chip_gen: v7x
topology: tpu7x:2x2x1
jax: 0.10.0
libtpu: 0.0.40
codegen_flags: <defaults>
</compile_context>

<pallas_src>
import jax
import jax.numpy as jnp
from jax.experimental import pallas as pl
from jax.experimental.pallas import tpu as pltpu


def _outconv_kernel(x_ref, w_ref, b_ref, o_ref):
    # x_ref: (1, Cin, St)   w_ref: (Cout, Cin)   b_ref: (Cout, 1)   o_ref: (1, Cout, St)
    acc = jnp.dot(w_ref[...], x_ref[0], preferred_element_type=jnp.float32)
    o_ref[0] = (acc + b_ref[...]).astype(o_ref.dtype)


def _choose_s_tile(S, target):
    """Pick a lane-dense spatial tile: full extent if small, else a multiple of 128."""
    if S <= target:
        return S  # full-extent block is always layout-legal
    return max((target // 128) * 128, 128)


def outconv_forward(x, weight, bias, *, s_tile_target=128 * 1024):
    """1x1x1 Conv3d, identical semantics to nn.Conv3d(kernel_size=1).

    x: (N, Cin, D, H, W); weight: (Cout, Cin, 1, 1, 1); bias: (Cout,).
    Returns (N, Cout, D, H, W).
    """
    N, Cin, D, H, W = x.shape
    Cout = weight.shape[0]
    S = D * H * W

    x3 = x.reshape(N, Cin, S)          # channels-first view, no HBM transpose
    w2 = weight.reshape(Cout, Cin)
    b2 = bias.reshape(Cout, 1)

    s_tile = _choose_s_tile(S, s_tile_target)
    grid = (N, pl.cdiv(S, s_tile))

    y3 = pl.pallas_call(
        _outconv_kernel,
        out_shape=jax.ShapeDtypeStruct((N, Cout, S), x.dtype),
        grid_spec=pltpu.PrefetchScalarGridSpec(
            num_scalar_prefetch=0,
            grid=grid,
            in_specs=[
                pl.BlockSpec((1, Cin, s_tile), lambda n, j: (n, 0, j)),
                pl.BlockSpec((Cout, Cin), lambda n, j: (0, 0)),
                pl.BlockSpec((Cout, 1), lambda n, j: (0, 0)),
            ],
            out_specs=pl.BlockSpec((1, Cout, s_tile), lambda n, j: (n, 0, j)),
        ),
        compiler_params=pltpu.CompilerParams(
            dimension_semantics=("parallel", "parallel"),
        ),
    )(x3, w2, b2)

    # Free reshape back to NCDHW (layout already channels-first).
    return y3.reshape(N, Cout, D, H, W)


if __name__ == "__main__":
    key = jax.random.PRNGKey(0)
    k_x, k_w, k_b = jax.random.split(key, 3)

    N, Cin, Cout = 2, 4, 2
    D, H, W = 8, 16, 16

    x = jax.random.normal(k_x, (N, Cin, D, H, W), dtype=jnp.float32)
    # Deterministic synthetic parameters (PyTorch shapes: (Cout, Cin, 1, 1, 1), (Cout,))
    fan_in = Cin  # kernel volume = 1
    bound = 1.0 / (fan_in ** 0.5)
    weight = jax.random.uniform(
        k_w, (Cout, Cin, 1, 1, 1), minval=-bound, maxval=bound, dtype=jnp.float32
    )
    bias = jax.random.uniform(
        k_b, (Cout,), minval=-bound, maxval=bound, dtype=jnp.float32
    )

    y = outconv_forward(x, weight, bias)
    jax.block_until_ready(y)

    # Reference check against plain JAX einsum (same math as Conv3d k=1).
    y_ref = jnp.einsum("ncdhw,oc->nodhw", x, weight.reshape(Cout, Cin)) + bias[
        None, :, None, None, None
    ]
    assert y.shape == (N, Cout, D, H, W)
    assert jnp.allclose(y, y_ref, atol=1e-5, rtol=1e-5)

    print("KERNEL_OK")
</pallas_src>

<mosaic_0001>
module attributes {stable_mosaic.version = 11 : i64} {
  func.func @_outconv_kernel(%arg0: i32, %arg1: i32, %arg2: memref<1x4x2048xf32, #tpu.memory_space<vmem>>, %arg3: memref<2x4xf32, #tpu.memory_space<vmem>>, %arg4: memref<2x1xf32, #tpu.memory_space<vmem>>, %arg5: memref<1x2x2048xf32, #tpu.memory_space<vmem>>) attributes {dimension_semantics = [#tpu.dimension_semantics<parallel>, #tpu.dimension_semantics<parallel>], iteration_bounds = array<i64: 2, 1>, scalar_prefetch = 0 : i64, scratch_operands = 0 : i64, tpu.core_type = #tpu.core_type<tc>, window_params = [{transform_indices = @transform_0, window_bounds = array<i64: 1, 4, 2048>}, {pipeline_mode = #tpu.pipeline_mode<synchronous>, transform_indices = @transform_1, window_bounds = array<i64: 2, 4>}, {pipeline_mode = #tpu.pipeline_mode<synchronous>, transform_indices = @transform_2, window_bounds = array<i64: 2, 1>}, {transform_indices = @transform_3, window_bounds = array<i64: 1, 2, 2048>}]} {
    %c0 = arith.constant 0 : index
    %c0_0 = arith.constant 0 : index
    %0 = vector.load %arg3[%c0, %c0_0] : memref<2x4xf32, #tpu.memory_space<vmem>>, vector<2x4xf32>
    %c0_1 = arith.constant 0 : index
    %c0_2 = arith.constant 0 : index
    %c0_3 = arith.constant 0 : index
    %1 = vector.load %arg2[%c0_1, %c0_2, %c0_3] : memref<1x4x2048xf32, #tpu.memory_space<vmem>>, vector<1x4x2048xf32>
    %2 = vector.shape_cast %1 : vector<1x4x2048xf32> to vector<4x2048xf32>
    %cst = arith.constant dense<0.000000e+00> : vector<2x2048xf32>
    %3 = tpu.matmul %0, %2, %cst {dimension_numbers = #tpu.dot_dimension_numbers<[1], [0], [0], [1], [0, 0, 1, 1], [], []>} : vector<2x4xf32>, vector<4x2048xf32>, vector<2x2048xf32> -> vector<2x2048xf32>
    %c0_4 = arith.constant 0 : index
    %c0_5 = arith.constant 0 : index
    %4 = vector.load %arg4[%c0_4, %c0_5] : memref<2x1xf32, #tpu.memory_space<vmem>>, vector<2x1xf32>
    %5 = vector.broadcast %4 : vector<2x1xf32> to vector<2x2048xf32>
    %6 = arith.addf %3, %5 : vector<2x2048xf32>
    %c0_6 = arith.constant 0 : index
    %c0_7 = arith.constant 0 : index
    %c0_8 = arith.constant 0 : index
    %7 = vector.load %arg5[%c0_6, %c0_7, %c0_8] : memref<1x2x2048xf32, #tpu.memory_space<vmem>>, vector<1x2x2048xf32>
    %8 = vector.shape_cast %7 : vector<1x2x2048xf32> to vector<2x2048xf32>
    %9 = vector.shape_cast %6 : vector<2x2048xf32> to vector<1x2x2048xf32>
    tpu.vector_store %arg5[%c0_6, %c0_7, %c0_8], %9 {strides = array<i32>} : memref<1x2x2048xf32, #tpu.memory_space<vmem>>, vector<1x2x2048xf32>,
    return
  }
  func.func @transform_0(%arg0: i32, %arg1: i32) -> (i32, i32, i32) {
    %c0_i32 = arith.constant 0 : i32
    %c0_i32_0 = arith.constant 0 : i32
    return %arg0, %c0_i32, %arg1 : i32, i32, i32
  }
  func.func @transform_1(%arg0: i32, %arg1: i32) -> (i32, i32) {
    %c0_i32 = arith.constant 0 : i32
    %c0_i32_0 = arith.constant 0 : i32
    %c0_i32_1 = arith.constant 0 : i32
    return %c0_i32, %c0_i32_0 : i32, i32
  }
  func.func @transform_2(%arg0: i32, %arg1: i32) -> (i32, i32) {
    %c0_i32 = arith.constant 0 : i32
    %c0_i32_0 = arith.constant 0 : i32
    %c0_i32_1 = arith.constant 0 : i32
    return %c0_i32, %c0_i32_0 : i32, i32
  }
  func.func @transform_3(%arg0: i32, %arg1: i32) -> (i32, i32, i32) {
    %c0_i32 = arith.constant 0 : i32
    %c0_i32_0 = arith.constant 0 : i32
    return %arg0, %c0_i32, %arg1 : i32, i32, i32
  }
}

</mosaic_0001>

<bundles_post_ra>
// kernel: tpu_custom_call.1
= control target key start
LH: loop header
LB: loop body
LE: loop exit
PB: predicated region body
PF: predicated region fallthrough
CT: control target
= control target key end

     0   :  { %8 = vsyncpa [#allocation3], 0  ;;  %s1510_s0 = inlined_call_operand.hbm [shape: f32[2,4,2048], index: 0, kind: input, shape index: {}]   ;;  %s1511_s1 = inlined_call_operand.vmem [shape: f32[2,4], index: 1, kind: input, shape index: {}]   ;;  %s1512_s2 = inlined_call_operand.vmem [shape: f32[2,1], index: 2, kind: input, shape index: {}]   ;;  %s1513_s3 = inlined_call_operand.hbm [shape: f32[2,2,2048], index: 3, kind: output, shape index: {}]  }
   0x1   :  { %10 = vsyncpa [#allocation3 + $0x1], 0 }
   0x2   :  { %11 = vsyncpa [#allocation4], 0 }
   0x3   :  { %13 = vsyncpa [#allocation4 + $0x1], 0  ;;  %s1290_s12 = smov 0   ;;  %s1292_s13 = smov 0  }
   0x4   :  { %s1294_s14 = smov 0   ;;  %s1296_s15 = smov 0  }
   0x5   :  { %s1298_s16 = smov 0   ;;  %s1300_s17 = smov 0  }
   0x6 LB: > { %s1036_s18 = sadd.s32 4294967295, %s1263_s17   ;;  %s1037_s19 = sadd.s32 4294967294, %s1263_s17   ;;  %s1263_s17 = sphi %s1300_s17, %s19_s17   ;;  %s1259_s16 = sphi %s1298_s16, %s1529_s16   ;;  %s1255_s15 = sphi %s1296_s15, %s1528_s15   ;;  %s1251_s14 = sphi %s1294_s14, %s1527_s14   ;;  %s1247_s13 = sphi %s1292_s13, %s1526_s13   ;;  %s1243_s12 = sphi %s1290_s12, %s1525_s12  }
   0x7   : > { %s31_s20 = sadd.s32 1, %s1259_s16  ;;  %s40_s21 = sadd.s32 1, %s1251_s14 }
   0x8   : > { %p33_p0 = scmp.ge.s32.totalorder %s31_s20, 2  ;;  %p47_p1 = scmp.ne.s32.totalorder %s1251_s14, %s1247_s13 }
   0x9   : > { %p48_p2 = scmp.eq.s32.totalorder %s1263_s17, 0  ;;  %p53_p3 = scmp.ne.s32.totalorder %s1247_s13, %s1243_s12 }
   0xa   : > { %s1531_s20 = smov (%p33_p0, %s31_s20), 0  ;;  %p54_p5 = scmp.eq.s32.totalorder %s1036_s18, 0 }
   0xb   : > { %p1331_p4 = por %p48_p2, %p47_p1  ;;  %s35_s23 = ssub.s32 %s1259_s16, %s1531_s20 }
   0xc   : > { %p121_p6 = scmp.eq.s32.totalorder %s1036_s18, 1  ;;  %p38_p7 = scmp.eq.s32.totalorder %s35_s23, 0 }
   0xd   : > { %p1337_p8 = por %p54_p5, %p53_p3  ;;  %p127_p10 = scmp.eq.s32.totalorder %s1037_s19, 1 }
   0xe   : > { %p1341_p9 = por %p121_p6, %p47_p1  ;;  %p1089_p13 = scmp.lt.s32.totalorder %s1263_s17, 2 }
   0xf   : > { %s1346_s26 = scalar_select %p38_p7, %s1251_s14, %s40_s21  }
  0x10   : > { %s1517_s25 = scalar_select %p1341_p9, 1, 0 }
  0x11   : > { %p1348_p11 = por %p127_p10, %p53_p3  ;;  %s153_s28 = sand.u32 1, %s1251_s14  }
  0x12   : > { %s1040_s29 = sshll.u32 %s153_s28, 6  ;;  %s1075_s30 = sshll.u32 %s1259_s16, 10 }
  0x13   : > { %s1518_s27 = scalar_select %p1348_p11, 1, 0 }
  0x14   : > { %s1359_s6 = scalar_lea.hbm %s1510_s0, %s1075_s30  ;;  %s157_s7 = scalar_lea.vmem [#allocation2], %s1040_s29 }
  0x15   : > { %s167_s8 = sshll.u32 %s157_s7, 4  ;;  %p1365_p0 = pnand %p1089_p13, %p1331_p4  ;;  %s1361_s8 = int_to_ptr.vmem [resolvable:$true] %s167_s8 }
  0x16   : > { %s154_s10 = scalar_lea.sflag [#allocation3], %s153_s28  ;;  %s1151_s11 = scalar_lea.hbm %s1359_s6, 1024 }
  0x17   : > { %p1152_p3 = scmp.ne.s32.totalorder %s1359_s6, %s1151_s11  ;;  %p1153_p5 = pneg %p1365_p0 }
  0x18   : > { %s1156_s21 = scalar_lea.hbm %s1510_s0, 2048  ;;  %p1157_p4 = scmp.lt.u32.totalorder %s1359_s6, %s1510_s0 }
  0x19   : > { %p1154_p6 = pnand %p1153_p5, %p1152_p3  ;;  %p1158_p10 = scmp.lt.u32.totalorder %s1156_s21, %s1151_s11 }
  0x1a   : > { %p1160_p12 = scmp.lt.u32.totalorder %s1151_s11, %s1359_s6 }
  0x1b   : > { %p1155_p7 = pneg %p1154_p6  ;;  %p1159_p13 = por %p1158_p10, %p1157_p4 }
  0x1d   : > { %p1161_p1 = por %p1160_p12, %p1159_p13 }
  0x1f   : > { %p1162_p2 = pnand %p1161_p1, %p1155_p7 }
  0x21   : > { %1165 = shalt.err (!%p1162_p2)
}
  0x22   : > { %s1166_s28 = scalar_lea.vmem %s1361_s8, 1024  ;;  %s1265_s29 = smov [#allocation2]  }
  0x23   : > { %p1167_p3 = scmp.ne.s32.totalorder %s1361_s8, %s1166_s28  ;;  %s1171_s30 = sshll.u32 %s1265_s29, 4  ;;  %s1172_s30 = int_to_ptr.vmem [resolvable:$false] %s1171_s30 }
  0x24   : > { %s1173_s4 = scalar_lea.vmem %s1172_s30, 2048  ;;  %p1174_p9 = scmp.lt.s32.totalorder %s1361_s8, %s1172_s30 }
  0x25   : > { %p1169_p6 = pnand %p1167_p3, %p1153_p5  ;;  %p1175_p4 = scmp.lt.s32.totalorder %s1173_s4, %s1166_s28 }
  0x27   : > { %p1170_p11 = pneg %p1169_p6  ;;  %p1176_p10 = por %p1175_p4, %p1174_p9 }
  0x29   : > { %p1177_p12 = pnand %p1176_p10, %p1170_p11 }
  0x2b   : > { %1180 = shalt.err (!%p1177_p12)
}
  0x2c   : > { %1084 = dma.hbm_to_vmem [thread:$0]  (!%p1365_p0), %s1359_s6, 1024, %s1361_s8, %s154_s10  }
  0x2d   : > { %p1520_p1 = scmp.lt.s32.totalorder %s1263_s17, 3  ;;  %p1521_p2 = scmp.ge.s32.totalorder %s1263_s17, 1 }
  0x2f   : > { %p173_p5 = pnand %p1521_p2, %p1520_p1 }
  0x30   : > { %s1401_s5 = sand.u32 (!%p173_p5), 1, %s1247_s13  }
  0x31   : > { %176 = sbr.rel (%p173_p5) target bundleno = 309 (0x135), region = 32  ;;  %s1044_s7 = sshll.u32 (!%p173_p5), %s1401_s5, 6 }
  0x32   : > { %s179_s11 = scalar_lea.sflag (!%p173_p5), [#allocation3], %s1401_s5  ;;  %s1405_s18 = scalar_lea.vmem (!%p173_p5), [#allocation2], %s1044_s7 }
  0x38   : > { %1234 = dma.done.wait (%p1337_p8), %s179_s11, 1024  }
  0x39   : > { %1236 = vsyncadd (%p1337_p8), %s179_s11, 4294966272  ;;  %v1266_v0 = vmov 0.0   ;;  %v1267_v1 = vmov 0   ;;  %v208_v2 = vld [vmem:[%s1405_s18] sm:$0xff]  ;;  %vm242_vm0 = vcmask 1043456   ;;  %v209_v3 = vld [vmem:[%s1405_s18 + $0x8] sm:$0xff]  ;;  %v864_v22 = vlaneseq }
  0x3a   : > { %339 = vmatprep.mubr.f32.mxu0 %v1266_v0  ;;  %410 = vmatprep.mubr.f32.mxu1 %v1266_v0  ;;  %v230_v4 = vcombine.high %v208_v2, %v208_v2  ;;  %v231_v5 = vcombine.high %v209_v3, %v209_v3  ;;  %v210_v6 = vld [vmem:[%s1405_s18 + $0x10] sm:$0xff]  ;;  %v211_v7 = vld [vmem:[%s1405_s18 + $0x18] sm:$0xff]  ;;  %v207_v8 = vld [vmem:[%s1511_s1] sm:$0x3]  ;;  %vm238_vm1 = vcmask 31744   ;;  %s1045_s10 = sshll.u32 %s1401_s5, 5 }
  0x3b   : > { %1142 = vset.pattern.permute.xlu0 %v1267_v1  ;;  %v232_v9 = vcombine.high %v210_v6, %v210_v6  ;;  %v233_v10 = vcombine.high %v211_v7, %v211_v7  ;;  %v212_v11 = vld [vmem:[%s1405_s18 + $0x20] sm:$0xff]  ;;  %v213_v12 = vld [vmem:[%s1405_s18 + $0x28] sm:$0xff]  ;;  %v214_v15 = vld [vmem:[%s1405_s18 + $0x30] sm:$0xff]  ;;  %v1268_v20 = vmov 1983009808   ;;  %v865_v25 = vshrl.u32 %v864_v22, 7 }
  0x3c   : > { %1046 = vmatprep.subr.msk.mxu0 %vm242_vm0, %v230_v4  ;;  %1049 = vmatprep.subr.msk.mxu1 %vm242_vm0, %v231_v5  ;;  %v234_v13 = vcombine.high %v212_v11, %v212_v11  ;;  %v235_v14 = vcombine.high %v213_v12, %v213_v12  ;;  %v215_v16 = vld [vmem:[%s1405_s18 + $0x38] sm:$0xff]  ;;  %v236_v17 = vcombine.high %v214_v15, %v214_v15  ;;  %v216_v19 = vld [vmem:[%s1512_s2] sm:$0x3]  ;;  %v862_v21 = vunpack.c.l.s4 %v1268_v20  ;;  %s1450_s19 = scalar_lea.vmem [#allocation5], %s1045_s10  ;;  %s1076_s21 = sshll.u32 %s1255_s15, 9 }
  0x3d   : > { %1047 = vmatpush1.msk.msra.mxu0 %vm242_vm0, %v208_v2  ;;  %1050 = vmatpush1.msk.msra.mxu1 %vm242_vm0, %v209_v3  ;;  %v237_v18 = vcombine.high %v215_v16, %v215_v16  ;;  %s952_s22 = sshll.u32 %s1450_s19, 4  ;;  %s1460_s29 = scalar_lea.hbm %s1513_s3, %s1076_s21  ;;  %s1462_s22 = int_to_ptr.vmem [resolvable:$true] %s952_s22 }
  0x3e   : > { %1048 = vmatmul.mubr.msk.f32.vlgmr.msra.gmra.mrb[0].mxu0 %vm238_vm1, %v207_v8  ;;  %1051 = vmatmul.mubr.msk.f32.vlgmr.msra.gmra.mrb[0].mxu1 %vm238_vm1, %v207_v8  ;;  %v863_v24 = vunpack.c.0.s8 %v862_v21  ;;  %s936_s30 = scalar_lea.sflag [#allocation4], %s1401_s5  ;;  %s1181_s4 = scalar_lea.vmem %s1462_s22, 512 }
  0x3f   : > { %1052 = vmatprep.subr.msk.mxu0 %vm242_vm0, %v232_v9  ;;  %1055 = vmatprep.subr.msk.mxu1 %vm242_vm0, %v233_v10  ;;  %p1182_p8 = scmp.ne.s32.totalorder %s1462_s22, %s1181_s4  ;;  %p1522_p9 = scmp.ne.s32.totalorder %s1517_s25, 0 }
  0x40   : > { %1053 = vmatpush1.msk.msra.mxu0 %vm242_vm0, %v210_v6  ;;  %1056 = vmatpush1.msk.msra.mxu1 %vm242_vm0, %v211_v7  ;;  %v866_v33 = vsub.s32 %v863_v24, %v865_v25  ;;  %s1269_s15 = smov [#allocation5]  }
  0x41   : > { %481 = vmatprep.mubr.f32.mxu0 %v1266_v0  ;;  %552 = vmatprep.mubr.f32.mxu1 %v1266_v0  ;;  %p1183_p11 = pnand %p1182_p8, %p1522_p9  ;;  %s1185_s7 = sshll.u32 %s1269_s15, 4  ;;  %s1186_s7 = int_to_ptr.vmem [resolvable:$false] %s1185_s7 }
  0x42   : > { %1054 = vmatmul.mubr.msk.f32.vlgmr.msra.gmra.mrb[2].mxu0 %vm238_vm1, %v207_v8  ;;  %1057 = vmatmul.mubr.msk.f32.vlgmr.msra.gmra.mrb[2].mxu1 %vm238_vm1, %v207_v8  ;;  %s1187_s11 = scalar_lea.vmem %s1186_s7, 1024  ;;  %p1188_p7 = scmp.lt.s32.totalorder %s1462_s22, %s1186_s7 }
  0x43   : > { %1058 = vmatprep.subr.msk.mxu0 %vm242_vm0, %v234_v13  ;;  %1061 = vmatprep.subr.msk.mxu1 %vm242_vm0, %v235_v14  ;;  %p1184_p0 = pneg %p1183_p11  ;;  %p1189_p13 = scmp.lt.s32.totalorder %s1187_s11, %s1181_s4 }
  0x44   : > { %1059 = vmatpush1.msk.msra.mxu0 %vm242_vm0, %v212_v11  ;;  %1062 = vmatpush1.msk.msra.mxu1 %vm242_vm0, %v213_v12 }
  0x45   : > { %623 = vmatprep.mubr.f32.mxu0 %v1266_v0  ;;  %694 = vmatprep.mubr.f32.mxu1 %v1266_v0  ;;  %p1190_p3 = por %p1189_p13, %p1188_p7 }
  0x46   : > { %1060 = vmatmul.mubr.msk.f32.vlgmr.msra.gmra.mrb[4].mxu0 %vm238_vm1, %v207_v8  ;;  %1063 = vmatmul.mubr.msk.f32.vlgmr.msra.gmra.mrb[4].mxu1 %vm238_vm1, %v207_v8 }
  0x47   : > { %1064 = vmatprep.subr.msk.mxu0 %vm242_vm0, %v236_v17  ;;  %1067 = vmatprep.subr.msk.mxu1 %vm242_vm0, %v237_v18  ;;  %p1191_p6 = pnand %p1190_p3, %p1184_p0 }
  0x48   : > { %1065 = vmatpush1.msk.msra.mxu0 %vm242_vm0, %v214_v15  ;;  %1068 = vmatpush1.msk.msra.mxu1 %vm242_vm0, %v215_v16 }
  0x49   : > { %765 = vmatprep.mubr.f32.mxu0 %v1266_v0  ;;  %836 = vmatprep.mubr.f32.mxu1 %v1266_v0 }
  0x4a   : > { %1066 = vmatmul.mubr.msk.f32.vlgmr.msra.gmra.mrb[6].mxu0 %vm238_vm1, %v207_v8  ;;  %1069 = vmatmul.mubr.msk.f32.vlgmr.msra.gmra.mrb[6].mxu1 %vm238_vm1, %v207_v8 }
  0x4b   : > { %219 = vperm.xlu0 %1142, %v216_v19  }
  0xca   : > { %v220_v23 = vpop.permute.xlu0 %219 }
 0x111   : > { %v341_v26 = vpop.f32.mrb[0].mxu0  ;;  %v412_v27 = vpop.f32.mrb[0].mxu1 }
 0x112   : > { %v342_v28 = vadd.f32 %v341_v26, %v220_v23  ;;  %v343_v29 = vpop.f32.mrb[1].mxu0  ;;  %v413_v30 = vadd.f32 %v412_v27, %v220_v23  ;;  %v414_v31 = vpop.f32.mrb[1].mxu1 }
 0x113   : > { %v344_v32 = vadd.f32 %v343_v29, %v220_v23  ;;  %v415_v34 = vadd.f32 %v414_v31, %v220_v23 }
 0x115   : > { %v859_v35 = vcombine.low %v342_v28, %v344_v32  ;;  %v860_v36 = vcombine.low %v413_v30, %v415_v34  ;;  %v483_v37 = vpop.f32.mrb[2].mxu0  ;;  %v554_v38 = vpop.f32.mrb[2].mxu1 }
 0x116   : > { %v484_v39 = vadd.f32 %v483_v37, %v220_v23  ;;  %v555_v40 = vadd.f32 %v554_v38, %v220_v23  ;;  %v485_v41 = vpop.f32.mrb[3].mxu0  ;;  %v556_v42 = vpop.f32.mrb[3].mxu1 }
 0x117   : > { %v867_v43 = vrot.slane %v859_v35, %v866_v33  ;;  %v874_v44 = vrot.slane %v860_v36, %v866_v33  ;;  %v486_v45 = vadd.f32 %v485_v41, %v220_v23  ;;  %v557_v46 = vadd.f32 %v556_v42, %v220_v23 }
 0x119   : > { %v875_v47 = vcombine.low %v867_v43, %v874_v44  ;;  %v876_v48 = vcombine.low %v484_v39, %v486_v45  ;;  %v877_v49 = vcombine.low %v555_v40, %v557_v46  ;;  %v625_v50 = vpop.f32.mrb[4].mxu0  ;;  %v696_v51 = vpop.f32.mrb[4].mxu1 }
 0x11a   : > { %v626_v52 = vadd.f32 %v625_v50, %v220_v23  ;;  %v697_v53 = vadd.f32 %v696_v51, %v220_v23  ;;  %v627_v54 = vpop.f32.mrb[5].mxu0  ;;  %v698_v55 = vpop.f32.mrb[5].mxu1 }
 0x11b   : > { %931 = vst [vmem:[%s1450_s19] sm:$0xff] %v875_v47  ;;  %v884_v56 = vrot.slane %v876_v48, %v866_v33  ;;  %v891_v57 = vrot.slane %v877_v49, %v866_v33  ;;  %v628_v58 = vadd.f32 %v627_v54, %v220_v23  ;;  %v699_v59 = vadd.f32 %v698_v55, %v220_v23 }
 0x11d   : > { %v892_v60 = vcombine.low %v884_v56, %v891_v57  ;;  %v893_v61 = vcombine.low %v626_v52, %v628_v58  ;;  %v894_v62 = vcombine.low %v697_v53, %v699_v59  ;;  %v767_v63 = vpop.f32.mrb[6].mxu0  ;;  %v838_v0 = vpop.f32.mrb[6].mxu1 }
 0x11e   : > { %v768_v1 = vadd.f32 %v767_v63, %v220_v23  ;;  %v839_v2 = vadd.f32 %v838_v0, %v220_v23  ;;  %v769_v3 = vpop.f32.mrb[7].mxu0  ;;  %v840_v4 = vpop.f32.mrb[7].mxu1 }
 0x11f   : > { %932 = vst [vmem:[%s1450_s19 + $0x8] sm:$0xff] %v892_v60  ;;  %v901_v5 = vrot.slane %v893_v61, %v866_v33  ;;  %v908_v6 = vrot.slane %v894_v62, %v866_v33  ;;  %v770_v7 = vadd.f32 %v769_v3, %v220_v23  ;;  %v841_v8 = vadd.f32 %v840_v4, %v220_v23 }
 0x121   : > { %v909_v9 = vcombine.low %v901_v5, %v908_v6  ;;  %v910_v10 = vcombine.low %v768_v1, %v770_v7  ;;  %v911_v11 = vcombine.low %v839_v2, %v841_v8 }
 0x123   : > { %933 = vst [vmem:[%s1450_s19 + $0x10] sm:$0xff] %v909_v9  ;;  %v918_v12 = vrot.slane %v910_v10, %v866_v33  ;;  %v925_v13 = vrot.slane %v911_v11, %v866_v33 }
 0x125   : > { %v926_v14 = vcombine.low %v918_v12, %v925_v13 }
 0x127   : > { %934 = vst [vmem:[%s1450_s19 + $0x18] sm:$0xff] %v926_v14 }
 0x128   : > { %1194 = shalt.err (!%p1191_p6)
}
 0x129   : > { %s1195_s5 = scalar_lea.hbm %s1460_s29, 512  ;;  %s1199_s6 = scalar_lea.hbm %s1513_s3, 1024 }
 0x12a   : > { %p1196_p4 = scmp.ne.s32.totalorder %s1460_s29, %s1195_s5  ;;  %p1200_p1 = scmp.lt.u32.totalorder %s1460_s29, %s1513_s3 }
 0x12b   : > { %p1201_p2 = scmp.lt.u32.totalorder %s1199_s6, %s1195_s5  ;;  %p1203_p8 = scmp.lt.u32.totalorder %s1195_s5, %s1460_s29 }
 0x12c   : > { %p1197_p10 = pnand %p1196_p4, %p1522_p9 }
 0x12d   : > { %p1202_p5 = por %p1201_p2, %p1200_p1 }
 0x12e   : > { %p1198_p12 = pneg %p1197_p10 }
 0x12f   : > { %p1204_p11 = por %p1203_p8, %p1202_p5 }
 0x131   : > { %p1205_p0 = pnand %p1204_p11, %p1198_p12 }
 0x133   : > { %1208 = shalt.err (!%p1205_p0)
}
 0x134   : > { %1079 = dma.vmem_to_hbm [thread:$0]  (%p1522_p9), %s1462_s22, 512, %s1460_s29, %s936_s30  }
 0x135 PF: > { %s964_s10 = sand.u32 1, %s1243_s12   ;;  %p1523_p7 = scmp.ne.s32.totalorder %s1518_s27, 0 }
 0x136   : > { %p1524_p13 = scmp.ge.s32.totalorder %s1263_s17, 2  ;;  %s965_s19 = scalar_lea.sflag [#allocation4], %s964_s10 }
 0x138   : > { %p1086_p3 = pnand %p1524_p13, %p1523_p7 }
 0x13a   : > { %1238 = dma.done.wait (!%p1086_p3), %s965_s19, 512  }
 0x13b   : > { %1240 = vsyncadd (!%p1086_p3), %s965_s19, 4294966784  ;;  %s19_s17 = sadd.s32 1, %s1263_s17   ;;  %s1525_s12 = smov %s1247_s13 }
 0x13c   : > { %p16_p6 = scmp.ge.s32.totalorder %s19_s17, 4   ;;  %s1526_s13 = smov %s1251_s14 }
 0x13d   : > { %s1527_s14 = smov %s1346_s26  ;;  %s1528_s15 = smov %s1259_s16 }
 0x13e   : > { %s1529_s16 = smov %s1531_s20  ;;  %18 = sbr.rel (!%p16_p6) target bundleno = 6 (0x6), region = 77 }
 0x145   :  { %970 = vsyncpa [#allocation3], 1 }
 0x146   :  { %972 = vsyncpa [#allocation3 + $0x1], 1 }
 0x147   :  { %973 = vsyncpa [#allocation4], 1 }
 0x148   :  { %975 = vsyncpa [#allocation4 + $0x1], 1 }

</bundles_post_ra>
